<compile_context>
chip_gen: v6e
topology: v6e:2x2x1
jax: 0.10.0
libtpu: 0.0.40
codegen_flags: <defaults>
</compile_context>

<pallas_src>
import functools

import jax
import jax.numpy as jnp
from jax.experimental import pallas as pl
from jax.experimental.pallas import tpu as pltpu


def _input_proj_kernel(x_ref, wih_ref, b_ref, gx_ref):
    # One big matmul over all timesteps at once: (T*B, I) @ (I, 4H) + fused bias.
    gx_ref[...] = (
        jnp.dot(x_ref[...], wih_ref[...], preferred_element_type=jnp.float32)
        + b_ref[...]
    )


def _lstm_recurrence_kernel(gx_ref, whh_ref, h0_ref, c0_ref,
                            y_ref, hn_ref, cn_ref,
                            h_sc, c_sc, *, hidden_size, chunk):
    H = hidden_size
    t = pl.program_id(0)

    # Initialize recurrent state from the (already batch-tiled) learnable h0/c0.
    @pl.when(t == 0)
    def _():
        h_sc[...] = h0_ref[...]
        c_sc[...] = c0_ref[...]

    whh = whh_ref[...]                       # (H, 4H) resident weights, loaded once per chunk

    def step(s, carry):
        h, c = carry                         # (B, H), (B, H)
        # Per-timestep serial chain: only the hidden-state matmul + gate math.
        gates = gx_ref[s] + jnp.dot(h, whh, preferred_element_type=jnp.float32)  # (B, 4H)
        sig = jax.nn.sigmoid(gates)          # single EUP pass over the full 4H-lane vreg
        i_g = sig[:, 0 * H:1 * H]
        f_g = sig[:, 1 * H:2 * H]
        o_g = sig[:, 3 * H:4 * H]
        g_g = jnp.tanh(gates[:, 2 * H:3 * H])
        c_new = f_g * c + i_g * g_g
        h_new = o_g * jnp.tanh(c_new)
        y_ref[s] = h_new.astype(y_ref.dtype)
        return h_new, c_new

    h, c = jax.lax.fori_loop(0, chunk, step, (h_sc[...], c_sc[...]), unroll=True)
    h_sc[...] = h
    c_sc[...] = c

    # Only write the final-state outputs once, on the last grid step.
    @pl.when(t == pl.num_programs(0) - 1)
    def _():
        hn_ref[0] = h.astype(hn_ref.dtype)
        cn_ref[0] = c.astype(cn_ref.dtype)


def _pick_chunk(seq_len, target=8):
    """Largest chunk <= target that divides seq_len (avoids padded timesteps that
    would corrupt the recurrent state)."""
    tc = max(1, min(target, seq_len))
    while seq_len % tc:
        tc -= 1
    return tc


def augmented_lstm_forward(x, params, *, chunk_target=8):
    """x: (T, B, I) float32 (batch_first=False). Returns (y, (h_n, c_n)) like nn.LSTM."""
    T, B, I = x.shape
    H = params["h0"].shape[-1]
    G = 4 * H

    # ---- glue (off the serial path) -----------------------------------------
    wih_t = params["weight_ih"].T                              # (I, 4H)
    whh_t = params["weight_hh"].T                              # (H, 4H)
    bias = (params["bias_ih"] + params["bias_hh"]).reshape(1, G)
    # Mirrors self.h0.tile(1, batchsize, 1) in the PyTorch forward.
    h0_b = jnp.tile(params["h0"].reshape(1, H), (B, 1))        # (B, H)
    c0_b = jnp.tile(params["c0"].reshape(1, H), (B, 1))        # (B, H)

    # ---- hoisted input projection: one MXU matmul covering all timesteps ----
    # TODO(synk): tile the (T*B) axis of this projection for production-size
    # sequences; a single full-array block is fine at these shapes.
    gx2d = pl.pallas_call(
        _input_proj_kernel,
        out_shape=jax.ShapeDtypeStruct((T * B, G), jnp.float32),
        grid_spec=pltpu.PrefetchScalarGridSpec(
            num_scalar_prefetch=0,
            grid=(1,),
            in_specs=[
                pl.BlockSpec((T * B, I), lambda i: (0, 0)),
                pl.BlockSpec((I, G), lambda i: (0, 0)),
                pl.BlockSpec((1, G), lambda i: (0, 0)),
            ],
            out_specs=pl.BlockSpec((T * B, G), lambda i: (0, 0)),
        ),
        compiler_params=pltpu.CompilerParams(
            dimension_semantics=("parallel",),
        ),
    )(x.reshape(T * B, I), wih_t, bias)
    gx = gx2d.reshape(T, B, G)

    # ---- serial recurrence, CHUNK timesteps per grid step --------------------
    tc = _pick_chunk(T, chunk_target)
    kernel = functools.partial(_lstm_recurrence_kernel, hidden_size=H, chunk=tc)

    y, h_n, c_n = pl.pallas_call(
        kernel,
        out_shape=(
            jax.ShapeDtypeStruct((T, B, H), jnp.float32),
            jax.ShapeDtypeStruct((1, B, H), jnp.float32),
            jax.ShapeDtypeStruct((1, B, H), jnp.float32),
        ),
        grid_spec=pltpu.PrefetchScalarGridSpec(
            num_scalar_prefetch=0,
            grid=(T // tc,),
            in_specs=[
                pl.BlockSpec((tc, B, G), lambda t: (t, 0, 0)),   # G_x chunk
                pl.BlockSpec((H, G), lambda t: (0, 0)),          # W_hh^T (VMEM-resident)
                pl.BlockSpec((B, H), lambda t: (0, 0)),          # h0 tiled over batch
                pl.BlockSpec((B, H), lambda t: (0, 0)),          # c0 tiled over batch
            ],
            out_specs=[
                pl.BlockSpec((tc, B, H), lambda t: (t, 0, 0)),   # y
                pl.BlockSpec((1, B, H), lambda t: (0, 0, 0)),    # h_n (resident acc.)
                pl.BlockSpec((1, B, H), lambda t: (0, 0, 0)),    # c_n (resident acc.)
            ],
            scratch_shapes=[
                pltpu.VMEM((B, H), jnp.float32),                 # h state
                pltpu.VMEM((B, H), jnp.float32),                 # c state
            ],
        ),
        compiler_params=pltpu.CompilerParams(
            dimension_semantics=("arbitrary",),                  # time is a serial recurrence
        ),
    )(gx, whh_t, h0_b, c0_b)

    return y, (h_n, c_n)


def _reference_forward(x, params):
    """Pure-JAX reference (lax.scan) replicating nn.LSTM gate math."""
    T, B, I = x.shape
    H = params["h0"].shape[-1]
    wih_t = params["weight_ih"].T
    whh_t = params["weight_hh"].T
    bias = params["bias_ih"] + params["bias_hh"]
    h0 = jnp.tile(params["h0"].reshape(1, H), (B, 1))
    c0 = jnp.tile(params["c0"].reshape(1, H), (B, 1))

    def step(carry, x_t):
        h, c = carry
        gates = x_t @ wih_t + h @ whh_t + bias
        i_g = jax.nn.sigmoid(gates[:, 0 * H:1 * H])
        f_g = jax.nn.sigmoid(gates[:, 1 * H:2 * H])
        g_g = jnp.tanh(gates[:, 2 * H:3 * H])
        o_g = jax.nn.sigmoid(gates[:, 3 * H:4 * H])
        c_new = f_g * c + i_g * g_g
        h_new = o_g * jnp.tanh(c_new)
        return (h_new, c_new), h_new

    (h_n, c_n), ys = jax.lax.scan(step, (h0, c0), x)
    return ys, (h_n[None], c_n[None])


def init_params(key, input_size, hidden_size):
    """Deterministic synthetic init mirroring AugmentedLSTM.__init__ shapes."""
    k1, k2, k3, k4, k5, k6 = jax.random.split(key, 6)
    bound = 1.0 / jnp.sqrt(hidden_size)
    return {
        # nn.Parameter(0.001 * torch.randn(1, 1, hidden_size))
        "h0": 0.001 * jax.random.normal(k1, (1, 1, hidden_size), jnp.float32),
        "c0": 0.001 * jax.random.normal(k2, (1, 1, hidden_size), jnp.float32),
        # nn.LSTM(input_size, hidden_size) params: uniform(-1/sqrt(H), 1/sqrt(H))
        "weight_ih": jax.random.uniform(k3, (4 * hidden_size, input_size),
                                        jnp.float32, -bound, bound),
        "weight_hh": jax.random.uniform(k4, (4 * hidden_size, hidden_size),
                                        jnp.float32, -bound, bound),
        "bias_ih": jax.random.uniform(k5, (4 * hidden_size,), jnp.float32, -bound, bound),
        "bias_hh": jax.random.uniform(k6, (4 * hidden_size,), jnp.float32, -bound, bound),
    }


if __name__ == "__main__":
    SEQ, BATCH, INPUT, HIDDEN = 16, 2, 4, 32   # grid = 2 chunks of 8 timesteps

    key = jax.random.PRNGKey(0)
    kp, kx = jax.random.split(key)
    params = init_params(kp, INPUT, HIDDEN)
    x = jax.random.normal(kx, (SEQ, BATCH, INPUT), jnp.float32)

    y, (h_n, c_n) = augmented_lstm_forward(x, params)
    jax.block_until_ready((y, h_n, c_n))

    y_ref, (h_ref, c_ref) = _reference_forward(x, params)
    assert y.shape == (SEQ, BATCH, HIDDEN)
    assert h_n.shape == (1, BATCH, HIDDEN) and c_n.shape == (1, BATCH, HIDDEN)
    assert jnp.allclose(y, y_ref, atol=1e-4, rtol=1e-4)
    assert jnp.allclose(h_n, h_ref, atol=1e-4, rtol=1e-4)
    assert jnp.allclose(c_n, c_ref, atol=1e-4, rtol=1e-4)

    print("KERNEL_OK")
</pallas_src>

<mosaic_0001>
module attributes {stable_mosaic.version = 11 : i64} {
  func.func @_input_proj_kernel(%arg0: i32, %arg1: memref<32x4xf32, #tpu.memory_space<vmem>>, %arg2: memref<4x128xf32, #tpu.memory_space<vmem>>, %arg3: memref<1x128xf32, #tpu.memory_space<vmem>>, %arg4: memref<32x128xf32, #tpu.memory_space<vmem>>) attributes {dimension_semantics = [#tpu.dimension_semantics<parallel>], iteration_bounds = array<i64: 1>, scalar_prefetch = 0 : i64, scratch_operands = 0 : i64, tpu.core_type = #tpu.core_type<tc>, window_params = [{pipeline_mode = #tpu.pipeline_mode<synchronous>, transform_indices = @transform_0, window_bounds = array<i64: 32, 4>}, {pipeline_mode = #tpu.pipeline_mode<synchronous>, transform_indices = @transform_1, window_bounds = array<i64: 4, 128>}, {pipeline_mode = #tpu.pipeline_mode<synchronous>, transform_indices = @transform_2, window_bounds = array<i64: 1, 128>}, {pipeline_mode = #tpu.pipeline_mode<synchronous>, transform_indices = @transform_3, window_bounds = array<i64: 32, 128>}]} {
    %c0 = arith.constant 0 : index
    %c0_0 = arith.constant 0 : index
    %0 = vector.load %arg1[%c0, %c0_0] : memref<32x4xf32, #tpu.memory_space<vmem>>, vector<32x4xf32>
    %c0_1 = arith.constant 0 : index
    %c0_2 = arith.constant 0 : index
    %1 = vector.load %arg2[%c0_1, %c0_2] : memref<4x128xf32, #tpu.memory_space<vmem>>, vector<4x128xf32>
    %cst = arith.constant dense<0.000000e+00> : vector<32x128xf32>
    %2 = tpu.matmul %0, %1, %cst {dimension_numbers = #tpu.dot_dimension_numbers<[1], [0], [0], [1], [0, 0, 1, 1], [], []>} : vector<32x4xf32>, vector<4x128xf32>, vector<32x128xf32> -> vector<32x128xf32>
    %c0_3 = arith.constant 0 : index
    %c0_4 = arith.constant 0 : index
    %3 = vector.load %arg3[%c0_3, %c0_4] : memref<1x128xf32, #tpu.memory_space<vmem>>, vector<1x128xf32>
    %4 = vector.broadcast %3 : vector<1x128xf32> to vector<32x128xf32>
    %5 = arith.addf %2, %4 : vector<32x128xf32>
    %c0_5 = arith.constant 0 : index
    %c0_6 = arith.constant 0 : index
    %6 = vector.load %arg4[%c0_5, %c0_6] : memref<32x128xf32, #tpu.memory_space<vmem>>, vector<32x128xf32>
    tpu.vector_store %arg4[%c0_5, %c0_6], %5 {strides = array<i32>} : memref<32x128xf32, #tpu.memory_space<vmem>>, vector<32x128xf32>,
    return
  }
  func.func @transform_0(%arg0: i32) -> (i32, i32) {
    %c0_i32 = arith.constant 0 : i32
    %c0_i32_0 = arith.constant 0 : i32
    %c0_i32_1 = arith.constant 0 : i32
    return %c0_i32, %c0_i32_0 : i32, i32
  }
  func.func @transform_1(%arg0: i32) -> (i32, i32) {
    %c0_i32 = arith.constant 0 : i32
    %c0_i32_0 = arith.constant 0 : i32
    %c0_i32_1 = arith.constant 0 : i32
    return %c0_i32, %c0_i32_0 : i32, i32
  }
  func.func @transform_2(%arg0: i32) -> (i32, i32) {
    %c0_i32 = arith.constant 0 : i32
    %c0_i32_0 = arith.constant 0 : i32
    %c0_i32_1 = arith.constant 0 : i32
    return %c0_i32, %c0_i32_0 : i32, i32
  }
  func.func @transform_3(%arg0: i32) -> (i32, i32) {
    %c0_i32 = arith.constant 0 : i32
    %c0_i32_0 = arith.constant 0 : i32
    %c0_i32_1 = arith.constant 0 : i32
    return %c0_i32, %c0_i32_0 : i32, i32
  }
}

</mosaic_0001>

<bundles_post_ra>
// kernel: tpu_custom_call.1
= control target key start
LH: loop header
LB: loop body
LE: loop exit
PB: predicated region body
PF: predicated region fallthrough
CT: control target
= control target key end

     0   :  { %vm40_vm0 = vcmask 1043456   ;;  %vm27_vm1 = vcmask 31744   ;;  %s239_s0 = inlined_call_operand.vmem [shape: f32[32,4], index: 0, kind: input, shape index: {}]   ;;  %s240_s1 = inlined_call_operand.vmem [shape: f32[4,128], index: 1, kind: input, shape index: {}]   ;;  %s241_s2 = inlined_call_operand.vmem [shape: f32[1,128], index: 2, kind: input, shape index: {}]   ;;  %s242_s3 = inlined_call_operand.hbm [shape: f32[32,128], index: 3, kind: output, shape index: {}]  }
   0x1   :  { %v19_v0 = vld [vmem:[%s240_s1] sm:$0xf]  ;;  %v17_v2 = vld [vmem:[%s239_s0 + $0x10] sm:$0xff]  ;;  %v16_v3 = vld [vmem:[%s239_s0 + $0x8] sm:$0xff] }
   0x2   :  { %v15_v1 = vld [vmem:[%s239_s0] sm:$0xff]  ;;  %160 = vmatprep.subr.msk.mxu0 %vm40_vm0, %v19_v0  ;;  %168 = vmatprep.subr.msk.mxu1 %vm40_vm0, %v19_v0  ;;  %v18_v4 = vld [vmem:[%s239_s0 + $0x18] sm:$0xff] }
   0x3   :  { %8 = vsyncpa [#allocation3], 0  ;;  %161 = vmatpush3.msk.msra.mxu0 %vm40_vm0, %v19_v0  ;;  %169 = vmatpush3.msk.msra.mxu1 %vm40_vm0, %v19_v0  ;;  %v149_v5 = vld [vmem:[%s241_s2] ss:$0 sm:$0xff]  ;;  %s195_s23 = smov [#allocation2]  }
   0x4   :  { %162 = vmatprep.mubr.msk.f32.mxu0 %vm27_vm1, %v15_v1  ;;  %165 = vmatprep.mubr.msk.f32.mxu1 %vm27_vm1, %v17_v2  ;;  %s138_s24 = sshll.u32 %s195_s23, 4  ;;  %s139_s24 = int_to_ptr.vmem [resolvable:$true] %s138_s24 }
   0x5   :  { %163 = vmatmul.mubr.msk.f32.vlgmr.msra.gmra.mxu0 %vm27_vm1, %v16_v3  ;;  %166 = vmatmul.mubr.msk.f32.vlgmr.msra.gmra.mxu1 %vm27_vm1, %v18_v4  ;;  %s173_s0 = scalar_lea.vmem %s139_s24, 512  ;;  %p178_p1 = scmp.lt.s32.totalorder %s139_s24, %s139_s24 }
   0x6   :  { %p174_p0 = scmp.ne.s32.totalorder %s139_s24, %s173_s0  ;;  %p179_p2 = scmp.lt.s32.totalorder %s173_s0, %s173_s0 }
   0x8   :  { %p180_p3 = por %p179_p2, %p178_p1 }
   0xa   :  { %p181_p4 = pnand %p180_p3, %p174_p0 }
  0xc5   :  { %v164_v6 = vpop.f32.mrf.mxu0  ;;  %v167_v7 = vpop.f32.mrf.mxu1 }
  0xc6   :  { %v116_v8 = vadd.f32 %v164_v6, %v149_v5  ;;  %v126_v9 = vadd.f32 %v167_v7, %v149_v5 }
  0xc7   :  { %v110_v10 = vpop.f32.mrf.mxu0  ;;  %v120_v11 = vpop.f32.mrf.mxu1 }
  0xc8   :  { %130 = vst [vmem:[#allocation2 + $0x8] sm:$0xff] %v116_v8  ;;  %132 = vst [vmem:[#allocation2 + $0x18] sm:$0xff] %v126_v9  ;;  %v111_v12 = vadd.f32 %v149_v5, %v110_v10  ;;  %v121_v13 = vadd.f32 %v149_v5, %v120_v11 }
  0xca   :  { %129 = vst [vmem:[#allocation2] sm:$0xff] %v111_v12  ;;  %131 = vst [vmem:[#allocation2 + $0x10] sm:$0xff] %v121_v13 }
  0xcb   :  { %184 = shalt.err (!%p181_p4)
}
  0xcc   :  { %s196_s2 = smov 128   ;;  %s197_s25 = smov 8  }
  0xcd   :  { %144 = dma.vmem_to_hbm [thread:$0]  %s139_s24, 512, %s242_s3, [#allocation3], %s196_s2, %s196_s2, %s197_s25  }
  0xce   :  { %193 = dma.done.wait [#allocation3], 512  }
  0xcf   :  { %194 = vsyncadd [#allocation3], 4294966784 }
  0xd0   :  { %148 = vsyncpa [#allocation3], 1 }

</bundles_post_ra>
